<compile_context>
chip_gen: v5e
topology: v5e:2x2
jax: 0.10.0
libtpu: 0.0.40
codegen_flags: <defaults>
</compile_context>

<pallas_src>
import functools
import math

import jax
import jax.numpy as jnp
from jax import lax
from jax.experimental import pallas as pl
from jax.experimental.pallas import tpu as pltpu

_MID_CHUNK = 512          # FFN mid_dim chunk (single chunk at toy sizes)
_VMEM_LIMIT = 64 * 1024 * 1024


# ----------------------------- in-kernel helpers -----------------------------

def _ln(x, g, b, eps=1e-5):
    """LayerNorm over last dim, f32 statistics."""
    mu = jnp.mean(x, axis=-1, keepdims=True)
    xc = x - mu
    var = jnp.mean(xc * xc, axis=-1, keepdims=True)
    return xc * lax.rsqrt(var + eps) * g + b


def _bf16(x):
    return x.astype(jnp.bfloat16)


def _silu(x):
    return x * jax.nn.sigmoid(x)


# ----------------------------- fused transformer stack -----------------------------

def _stack_kernel(x_ref, g1_ref, b1_ref, wqkv_ref, wo_ref,
                  g2_ref, b2_ref, w1_ref, w2_ref, w3_ref,
                  o_ref, attn_ref, *, num_heads):
    l = pl.program_id(1)

    # layer 0: load the residual stream into the (VMEM-resident) output block
    @pl.when(l == 0)
    def _():
        o_ref[...] = x_ref[...]

    x = o_ref[...]                                     # (N, D) f32 residual stream
    N, D = x.shape
    hd = D // num_heads

    # ---- token mixer: pre-norm MHA (1/sqrt(hd) folded into Q weights) ----
    xn = _ln(x, g1_ref[...], b1_ref[...])
    qkv = jnp.dot(_bf16(xn), wqkv_ref[...],
                  preferred_element_type=jnp.float32)  # (N, 3D) f32
    qkv_b = _bf16(qkv)                                 # cast once

    for h in range(num_heads):                         # static, small head count
        q = qkv_b[:, h * hd:(h + 1) * hd]
        k = qkv_b[:, D + h * hd:D + (h + 1) * hd]
        v = qkv_b[:, 2 * D + h * hd:2 * D + (h + 1) * hd]
        s = lax.dot_general(q, k, (((1,), (1,)), ((), ())),
                            preferred_element_type=jnp.float32)      # (N, N)
        m = jnp.max(s, axis=-1, keepdims=True)
        p = jnp.exp(s - m)
        denom = jnp.sum(p, axis=-1, keepdims=True)                    # (N, 1)
        o = jnp.dot(_bf16(p), v, preferred_element_type=jnp.float32)  # (N, hd)
        # flash-style: normalize the small (N, hd) output, not the (N, N) probs
        o = o * pl.reciprocal(denom, approx=True)
        attn_ref[:, h * hd:(h + 1) * hd] = _bf16(o)    # static-slice scratch write

    attn = jnp.dot(attn_ref[...], wo_ref[...],
                   preferred_element_type=jnp.float32)
    x = x + attn

    # ---- channel mixer: pre-norm SiLU-GLU, mid_dim chunked, residual fused ----
    xn2 = _bf16(_ln(x, g2_ref[...], b2_ref[...]))
    mid = w1_ref.shape[1]
    y = x
    for start in range(0, mid, _MID_CHUNK):            # static chunk loop
        size = min(_MID_CHUNK, mid - start)
        w1c = w1_ref[:, start:start + size]
        w2c = w2_ref[:, start:start + size]
        w3c = w3_ref[start:start + size, :]
        h1 = jnp.dot(xn2, w1c, preferred_element_type=jnp.float32)
        h2 = jnp.dot(xn2, w2c, preferred_element_type=jnp.float32)
        hg = _silu(h1) * h2
        y = y + jnp.dot(_bf16(hg), w3c, preferred_element_type=jnp.float32)

    o_ref[...] = y


def transformer_stack(x, stack, num_heads):
    B, N, D = x.shape
    L = stack["wqkv"].shape[0]

    def lspec(arr):
        nd = arr.ndim
        return pl.BlockSpec((None,) + arr.shape[1:],
                            lambda b, l, _nd=nd: (l,) + (0,) * (_nd - 1))

    x_spec = pl.BlockSpec((None, N, D), lambda b, l: (b, 0, 0))

    return pl.pallas_call(
        functools.partial(_stack_kernel, num_heads=num_heads),
        out_shape=jax.ShapeDtypeStruct((B, N, D), jnp.float32),
        grid=(B, L),
        in_specs=[x_spec,
                  lspec(stack["ln1_g"]), lspec(stack["ln1_b"]),
                  lspec(stack["wqkv"]), lspec(stack["wo"]),
                  lspec(stack["ln2_g"]), lspec(stack["ln2_b"]),
                  lspec(stack["w1"]), lspec(stack["w2"]), lspec(stack["w3"])],
        out_specs=x_spec,
        scratch_shapes=[pltpu.VMEM((N, D), jnp.bfloat16)],
        compiler_params=pltpu.CompilerParams(
            dimension_semantics=("parallel", "arbitrary"),
            vmem_limit_bytes=_VMEM_LIMIT),
    )(x, stack["ln1_g"], stack["ln1_b"], stack["wqkv"], stack["wo"],
      stack["ln2_g"], stack["ln2_b"], stack["w1"], stack["w2"], stack["w3"])


# ----------------------------- in_proj + APE (batch-flattened rows) -----------------------------

def _in_proj_kernel(x_ref, w_ref, pe_ref, o_ref):
    o_ref[...] = jnp.dot(_bf16(x_ref[...]), w_ref[...],
                         preferred_element_type=jnp.float32) + pe_ref[...]


def in_proj_pe(x, w, pe):
    B, N, Din = x.shape
    D = w.shape[1]
    M = B * N
    xf = x.reshape(M, Din)
    pef = jnp.tile(pe, (B, 1))                          # (M, D) f32
    # TODO(synk): M-tile this grid (>=128-row tiles) at production M; single block here.
    out = pl.pallas_call(
        _in_proj_kernel,
        out_shape=jax.ShapeDtypeStruct((M, D), jnp.float32),
        grid=(1,),
        in_specs=[pl.BlockSpec((M, Din), lambda i: (0, 0)),
                  pl.BlockSpec(w.shape, lambda i: (0, 0)),
                  pl.BlockSpec((M, D), lambda i: (0, 0))],
        out_specs=pl.BlockSpec((M, D), lambda i: (0, 0)),
        compiler_params=pltpu.CompilerParams(
            dimension_semantics=("arbitrary",),
            vmem_limit_bytes=_VMEM_LIMIT),
    )(xf, w, pef)
    return out.reshape(B, N, D)


# ----------------------------- UpdateNetV2 ('additive') + final norm + reverse patch embed -----------------------------

def _update_final_kernel(x_ref, wkv_ref, fg_ref, fb_ref, rpe_ref,
                         o_ref, wm_ref, *, num_h_patch):
    P = num_h_patch
    x = x_ref[...]                                      # (N, D) f32
    N, D = x.shape

    # fused kv_proj (D->2P) + kv_h_proj (D->2D) in one lane-dense matmul
    proj = jnp.dot(_bf16(x), wkv_ref[...], preferred_element_type=jnp.float32)
    k = proj[:, :P]                                     # (N, P)
    v = proj[:, P:2 * P]                                # (N, P)
    kh = proj[:, 2 * P:2 * P + D]                       # (N, D)
    vh = proj[:, 2 * P + D:]                            # (N, D)

    # torch: k = act(einsum('b n d, b n h -> b h n d', k, k_h)); build (D, N, P)
    # so the sum over n becomes a D-batched MXU matmul instead of VPU reduce.
    kk = _silu(kh.T[:, :, None] * k[None, :, :])        # (D, N, P) f32
    vv = _silu(vh.T[:, :, None] * v[None, :, :])        # (D, N, P) f32
    # TODO(synk): tile the D (batch) axis at production sizes to bound kk/vv VMEM.
    wm = lax.dot_general(_bf16(kk), _bf16(vv),
                         (((1,), (1,)), ((0,), (0,))),
                         preferred_element_type=jnp.float32)  # (D, P, P): wm[h,d,e]

    # assemble lane-dense (P*P, D) weight matrix: rows = (d*P + e), lanes = h
    for d in range(P):                                  # static, P small
        wm_ref[d * P:(d + 1) * P, :] = wm[:, d, :].T    # (P, D) slab

    # fused final LayerNorm + reverse patch embed while still in VMEM
    xn = _ln(wm_ref[...], fg_ref[...], fb_ref[...])
    o_ref[...] = jnp.dot(_bf16(xn), rpe_ref[...],
                         preferred_element_type=jnp.float32)


def update_final(x, wkv, fg, fb, rpe_w, num_h_patch):
    B, N, D = x.shape
    P = num_h_patch
    Cpp = rpe_w.shape[1]
    return pl.pallas_call(
        functools.partial(_update_final_kernel, num_h_patch=P),
        out_shape=jax.ShapeDtypeStruct((B, P * P, Cpp), jnp.float32),
        grid=(B,),
        in_specs=[pl.BlockSpec((None, N, D), lambda b: (b, 0, 0)),
                  pl.BlockSpec(wkv.shape, lambda b: (0, 0)),
                  pl.BlockSpec(fg.shape, lambda b: (0, 0)),
                  pl.BlockSpec(fb.shape, lambda b: (0, 0)),
                  pl.BlockSpec(rpe_w.shape, lambda b: (0, 0))],
        out_specs=pl.BlockSpec((None, P * P, Cpp), lambda b: (b, 0, 0)),
        scratch_shapes=[pltpu.VMEM((P * P, D), jnp.float32)],
        compiler_params=pltpu.CompilerParams(
            dimension_semantics=("parallel",),
            vmem_limit_bytes=_VMEM_LIMIT),
    )(x, wkv, fg, fb, rpe_w)


# ----------------------------- model glue -----------------------------

def sincos_pe(n, d, base):
    half = d // 2
    pos = jnp.arange(n, dtype=jnp.float32)[:, None]
    freqs = jnp.exp(-jnp.log(base) * jnp.arange(half, dtype=jnp.float32) / half)
    ang = pos * freqs[None, :]
    return jnp.concatenate([jnp.sin(ang), jnp.cos(ang)], axis=-1)   # (n, d)


def decoder_forward(x, params):
    B, N, _ = x.shape
    D = params["embed_dim"]
    ps, C = params["patch_size"], params["channels"]
    Hh, Ww = params["num_h_patch"], params["num_w_patch"]
    # update_net produces num_h_patch^2 tokens (matches PyTorch); the subsequent
    # unpatchify is only consistent for square patch grids.
    assert Hh == Ww, "WeightMatrixTransformerDecoderV2 requires a square patch grid"

    pe = (sincos_pe(N, D, params["theta_base"]) if params["use_ape"]
          else jnp.zeros((N, D), jnp.float32))
    h = in_proj_pe(x, params["in_proj_w"], pe)                  # (B, N, D)
    h = transformer_stack(h, params["stack"], params["num_heads"])
    y = update_final(h, params["upd_w"], params["final_g"], params["final_b"],
                     params["rpe_w"], Hh)                       # (B, P*P, C*ps*ps)
    # 'b (h w) (c p1 p2) -> b c (h p1) (w p2)'
    y = y.reshape(B, Hh, Ww, C, ps, ps).transpose(0, 3, 1, 4, 2, 5)
    return y.reshape(B, C, Hh * ps, Ww * ps)


# ----------------------------- param init -----------------------------

def init_params(key, *, in_dim, embed_dim, num_heads, mid_dim, num_layers,
                num_h_patch, num_w_patch, patch_size, channels, theta_base):
    std = 0.02
    rescale = 1.0 / math.sqrt(2 * num_layers)       # use_rescale on out_proj / w3
    hd = embed_dim // num_heads
    qscale = 1.0 / math.sqrt(hd)                    # attention scale folded into Q weights

    def nrm(k, shape):
        return std * jax.random.normal(k, shape, dtype=jnp.float32)

    keys = iter(jax.random.split(key, 4 + 7 * num_layers))
    ln1g, ln1b, wqkv, wo, ln2g, ln2b, w1, w2, w3 = ([] for _ in range(9))
    for _ in range(num_layers):
        wq = nrm(next(keys), (embed_dim, embed_dim)) * qscale
        wk = nrm(next(keys), (embed_dim, embed_dim))
        wv = nrm(next(keys), (embed_dim, embed_dim))
        ln1g.append(jnp.ones((1, embed_dim), jnp.float32))
        ln1b.append(jnp.zeros((1, embed_dim), jnp.float32))
        wqkv.append(jnp.concatenate([wq, wk, wv], axis=1))
        wo.append(nrm(next(keys), (embed_dim, embed_dim)) * rescale)
        ln2g.append(jnp.ones((1, embed_dim), jnp.float32))
        ln2b.append(jnp.zeros((1, embed_dim), jnp.float32))
        w1.append(nrm(next(keys), (embed_dim, mid_dim)))
        w2.append(nrm(next(keys), (embed_dim, mid_dim)))
        w3.append(nrm(next(keys), (mid_dim, embed_dim)) * rescale)

    stack = dict(
        ln1_g=jnp.stack(ln1g), ln1_b=jnp.stack(ln1b),
        wqkv=jnp.stack(wqkv).astype(jnp.bfloat16),
        wo=jnp.stack(wo).astype(jnp.bfloat16),
        ln2_g=jnp.stack(ln2g), ln2_b=jnp.stack(ln2b),
        w1=jnp.stack(w1).astype(jnp.bfloat16),
        w2=jnp.stack(w2).astype(jnp.bfloat16),
        w3=jnp.stack(w3).astype(jnp.bfloat16),
    )

    kv_w = nrm(next(keys), (embed_dim, 2 * num_h_patch))
    kvh_w = nrm(next(keys), (embed_dim, 2 * embed_dim))
    return dict(
        embed_dim=embed_dim,
        num_heads=num_heads,
        use_ape=True,
        theta_base=theta_base,
        num_h_patch=num_h_patch,
        num_w_patch=num_w_patch,
        patch_size=patch_size,
        channels=channels,
        in_proj_w=nrm(next(keys), (in_dim, embed_dim)).astype(jnp.bfloat16),
        stack=stack,
        upd_w=jnp.concatenate([kv_w, kvh_w], axis=1).astype(jnp.bfloat16),
        final_g=jnp.ones((1, embed_dim), jnp.float32),
        final_b=jnp.zeros((1, embed_dim), jnp.float32),
        rpe_w=nrm(next(keys),
                  (embed_dim, channels * patch_size * patch_size)).astype(jnp.bfloat16),
    )


# ----------------------------- main -----------------------------

if __name__ == "__main__":
    # small config: image 16x16, patch 4 -> 4x4 patches, embed_dim 32
    B, N, in_dim = 2, 8, 16
    embed_dim, num_heads, mid_dim, num_layers = 32, 4, 64, 2
    image_size, patch_size, channels = 16, 4, 4
    num_h_patch = num_w_patch = image_size // patch_size
    theta_base = 10000.0

    key = jax.random.PRNGKey(0)
    kx, kp = jax.random.split(key)
    x = jax.random.normal(kx, (B, N, in_dim), dtype=jnp.float32)
    params = init_params(kp, in_dim=in_dim, embed_dim=embed_dim,
                         num_heads=num_heads, mid_dim=mid_dim,
                         num_layers=num_layers, num_h_patch=num_h_patch,
                         num_w_patch=num_w_patch, patch_size=patch_size,
                         channels=channels, theta_base=theta_base)

    out = decoder_forward(x, params)
    out = jax.block_until_ready(out)
    assert out.shape == (B, channels, image_size, image_size), out.shape
    assert bool(jnp.all(jnp.isfinite(out)))
    print("KERNEL_OK")
</pallas_src>

<mosaic_0001>
module attributes {stable_mosaic.version = 11 : i64} {
  func.func @_in_proj_kernel(%arg0: i32, %arg1: memref<16x16xf32, #tpu.memory_space<vmem>>, %arg2: memref<16x32xbf16, #tpu.memory_space<vmem>>, %arg3: memref<16x32xf32, #tpu.memory_space<vmem>>, %arg4: memref<16x32xf32, #tpu.memory_space<vmem>>) attributes {dimension_semantics = [#tpu.dimension_semantics<arbitrary>], iteration_bounds = array<i64: 1>, scalar_prefetch = 0 : i64, scratch_operands = 0 : i64, tpu.core_type = #tpu.core_type<tc>, window_params = [{pipeline_mode = #tpu.pipeline_mode<synchronous>, transform_indices = @transform_0, window_bounds = array<i64: 16, 16>}, {pipeline_mode = #tpu.pipeline_mode<synchronous>, transform_indices = @transform_1, window_bounds = array<i64: 16, 32>}, {pipeline_mode = #tpu.pipeline_mode<synchronous>, transform_indices = @transform_2, window_bounds = array<i64: 16, 32>}, {pipeline_mode = #tpu.pipeline_mode<synchronous>, transform_indices = @transform_3, window_bounds = array<i64: 16, 32>}]} {
    %c0 = arith.constant 0 : index
    %c0_0 = arith.constant 0 : index
    %0 = vector.load %arg1[%c0, %c0_0] : memref<16x16xf32, #tpu.memory_space<vmem>>, vector<16x16xf32>
    %1 = arith.truncf %0 : vector<16x16xf32> to vector<16x16xbf16>
    %c0_1 = arith.constant 0 : index
    %c0_2 = arith.constant 0 : index
    %2 = vector.load %arg2[%c0_1, %c0_2] : memref<16x32xbf16, #tpu.memory_space<vmem>>, vector<16x32xbf16>
    %cst = arith.constant dense<0.000000e+00> : vector<16x32xf32>
    %3 = tpu.matmul %1, %2, %cst {dimension_numbers = #tpu.dot_dimension_numbers<[1], [0], [0], [1], [0, 0, 1, 1], [], []>} : vector<16x16xbf16>, vector<16x32xbf16>, vector<16x32xf32> -> vector<16x32xf32>
    %c0_3 = arith.constant 0 : index
    %c0_4 = arith.constant 0 : index
    %4 = vector.load %arg3[%c0_3, %c0_4] : memref<16x32xf32, #tpu.memory_space<vmem>>, vector<16x32xf32>
    %5 = arith.addf %3, %4 : vector<16x32xf32>
    %c0_5 = arith.constant 0 : index
    %c0_6 = arith.constant 0 : index
    %6 = vector.load %arg4[%c0_5, %c0_6] : memref<16x32xf32, #tpu.memory_space<vmem>>, vector<16x32xf32>
    tpu.vector_store %arg4[%c0_5, %c0_6], %5 {strides = array<i32>} : memref<16x32xf32, #tpu.memory_space<vmem>>, vector<16x32xf32>,
    return
  }
  func.func @transform_0(%arg0: i32) -> (i32, i32) {
    %c0_i32 = arith.constant 0 : i32
    %c0_i32_0 = arith.constant 0 : i32
    %c0_i32_1 = arith.constant 0 : i32
    return %c0_i32, %c0_i32_0 : i32, i32
  }
  func.func @transform_1(%arg0: i32) -> (i32, i32) {
    %c0_i32 = arith.constant 0 : i32
    %c0_i32_0 = arith.constant 0 : i32
    %c0_i32_1 = arith.constant 0 : i32
    return %c0_i32, %c0_i32_0 : i32, i32
  }
  func.func @transform_2(%arg0: i32) -> (i32, i32) {
    %c0_i32 = arith.constant 0 : i32
    %c0_i32_0 = arith.constant 0 : i32
    %c0_i32_1 = arith.constant 0 : i32
    return %c0_i32, %c0_i32_0 : i32, i32
  }
  func.func @transform_3(%arg0: i32) -> (i32, i32) {
    %c0_i32 = arith.constant 0 : i32
    %c0_i32_0 = arith.constant 0 : i32
    %c0_i32_1 = arith.constant 0 : i32
    return %c0_i32, %c0_i32_0 : i32, i32
  }
}

</mosaic_0001>

<bundles_post_ra>
// kernel: tpu_custom_call.1
= control target key start
LH: loop header
LB: loop body
LE: loop exit
PB: predicated region body
PF: predicated region fallthrough
CT: control target
= control target key end

     0   :  { %8 = vsyncpa [#allocation3], 0  ;;  %s282_s0 = inlined_call_operand.hbm [shape: f32[16,16], index: 0, kind: input, shape index: {}]   ;;  %s283_s1 = inlined_call_operand.hbm [shape: bf16[16,32], index: 1, kind: input, shape index: {}]   ;;  %s284_s2 = inlined_call_operand.hbm [shape: f32[16,32], index: 2, kind: input, shape index: {}]   ;;  %s285_s3 = inlined_call_operand.hbm [shape: f32[16,32], index: 3, kind: output, shape index: {}]  }
   0x1   :  { %9 = vsyncpa [#allocation6], 0  ;;  %s28_s14 = sshll.u32 %s283_s1, 4  ;;  %s29_s14 = int_to_ptr.hbm [resolvable:$true] %s28_s14 }
   0x2   :  { %10 = vsyncpa [#allocation4], 0  ;;  %s233_s15 = smov [#allocation5]   ;;  %s15_s19 = sshll.u32 %s282_s0, 4  ;;  %s16_s19 = int_to_ptr.hbm [resolvable:$true] %s15_s19 }
   0x3   :  { %s30_s16 = sshll.u32 %s233_s15, 4  ;;  %s234_s20 = smov 64   ;;  %s31_s16 = int_to_ptr.vmem [resolvable:$true] %s30_s16 }
   0x4   :  { %s235_s21 = smov 4   ;;  %s236_s22 = smov [#allocation2]  }
   0x5   :  { %36 = dma.hbm_to_vmem [thread:$0]  %s29_s14, 128, %s31_s16, [#allocation6], %s234_s20, %s234_s20, %s235_s21  }
   0x6   :  { %s17_s23 = sshll.u32 %s236_s22, 4  ;;  %s237_s24 = smov 128   ;;  %s18_s23 = int_to_ptr.vmem [resolvable:$true] %s17_s23 }
   0x7   :  { %s238_s25 = smov 8   ;;  %s41_s27 = sshll.u32 %s284_s2, 4  ;;  %s42_s27 = int_to_ptr.hbm [resolvable:$true] %s41_s27 }
   0x8   :  { %23 = dma.hbm_to_vmem [thread:$0]  %s16_s19, 256, %s18_s23, [#allocation3], %s237_s24, %s237_s24, %s238_s25  }
   0x9   :  { %s239_s28 = smov [#allocation7]  }
   0xa   :  { %s43_s0 = sshll.u32 %s239_s28, 4  ;;  %s44_s0 = int_to_ptr.vmem [resolvable:$true] %s43_s0 }
   0xb   :  { %49 = dma.hbm_to_vmem [thread:$0]  %s42_s27, 256, %s44_s0, [#allocation6], %s237_s24, %s237_s24, %s238_s25  }
   0xc   :  { %227 = dma.done.wait [#allocation3], 256  }
   0xd   :  { %228 = vsyncadd [#allocation3], 4294967040 }
   0xe   :  { %229 = dma.done.wait [#allocation6], 384  }
   0xf   :  { %230 = vsyncadd [#allocation6], 4294966912  ;;  %v122_v0 = vld [vmem:[#allocation5] sm:$0xff]  ;;  %v63_v1 = vld [vmem:[#allocation2] sm:$0xff]  ;;  %vm76_vm0 = vcmask 130048   ;;  %vm94_vm1 = vcmask 261120  }
  0x10   :  { %v64_v2 = vld [vmem:[#allocation2 + $0x8] sm:$0xff]  ;;  %87 = vmatpush.bf16.msra.mxu0 %v122_v0  ;;  %v68_v4 = vld [vmem:[#allocation7] sm:$0xff]  ;;  %v69_v7 = vld [vmem:[#allocation7 + $0x8] sm:$0xff]  ;;  %s240_s2 = smov [#allocation8]   ;;  %s103_s5 = sshll.u32 %s285_s3, 4  ;;  %s104_s5 = int_to_ptr.hbm [resolvable:$true] %s103_s5 }
  0x11   :  { %v65_v3 = vpack.c.bf16 %v64_v2, %v63_v1  ;;  %s101_s29 = sshll.u32 %s240_s2, 4  ;;  %s102_s29 = int_to_ptr.vmem [resolvable:$true] %s101_s29 }
  0x13   :  { %121 = vmatmul.msk.bf16.vlgmr.msra.gmra.mxu0 %vm76_vm0, %v65_v3 }
  0x90   :  { %v89_v5 = vpop.f32.mrf.mxu0 }
  0x91   :  { %v90_v6 = vadd.f32 %v89_v5, %v68_v4 }
  0x93   :  { %95 = vst.msk [vmem:[#allocation8] sm:$0xff] %vm94_vm1, %v90_v6 }
  0x98   :  { %v91_v8 = vpop.f32.mrf.mxu0 }
  0x99   :  { %v92_v9 = vadd.f32 %v91_v8, %v69_v7 }
  0x9b   :  { %96 = vst.msk [vmem:[#allocation8 + $0x8] sm:$0xff] %vm94_vm1, %v92_v9 }
  0x9c   :  { %109 = dma.vmem_to_hbm [thread:$0]  %s102_s29, 256, %s104_s5, [#allocation4], %s237_s24, %s237_s24, %s238_s25  }
  0x9d   :  { %231 = dma.done.wait [#allocation4], 256  }
  0x9e   :  { %232 = vsyncadd [#allocation4], 4294967040 }
  0x9f   :  { %114 = vsyncpa [#allocation3], 1 }
  0xa0   :  { %115 = vsyncpa [#allocation6], 1 }
  0xa1   :  { %116 = vsyncpa [#allocation4], 1 }

</bundles_post_ra>
